<compile_context>
chip_gen: v7x
topology: tpu7x:2x2x1
jax: 0.10.0
libtpu: 0.0.40
codegen_flags: <defaults>
</compile_context>

<pallas_src>
import functools

import jax
import jax.numpy as jnp
from jax.experimental import pallas as pl
from jax.experimental.pallas import tpu as pltpu


def _channel_attention_kernel(x_ref, w1_ref, b1_ref, w2_ref, b2_ref,
                              out_ref, sum_acc, max_acc, *, inv_hw):
    """x_ref: (TB, THW, C) tile of the (B, HW, C) input.
    w1: (C, mid), b1: (1, mid), w2: (mid, C), b2: (1, C).
    out_ref: (TB, C) -- sigmoid(bottleneck(avg_pool) + bottleneck(max_pool))."""
    hw_i = pl.program_id(1)

    @pl.when(hw_i == 0)
    def _init():
        sum_acc[...] = jnp.zeros_like(sum_acc)
        max_acc[...] = jnp.full_like(max_acc, -jnp.inf)

    # Pooling accumulation: pure elementwise adds/maxes over (TB, THW, C),
    # channels stay lane-dense, no cross-lane reduce.
    x = x_ref[...].astype(jnp.float32)                      # (TB, THW, C)
    sum_acc[...] = sum_acc[...] + jnp.sum(x, axis=1)        # (TB, C)
    max_acc[...] = jnp.maximum(max_acc[...], jnp.max(x, axis=1))

    @pl.when(hw_i == pl.num_programs(1) - 1)
    def _finalize():
        avg_pool = sum_acc[...] * inv_hw                    # one mul, not per-tile mean
        max_pool = max_acc[...]
        tb = avg_pool.shape[0]

        # Fuse the two bottleneck passes: stack pools -> one pair of matmuls.
        pools = jnp.concatenate([avg_pool, max_pool], axis=0)          # (2*TB, C)
        h = jnp.dot(pools, w1_ref[...], preferred_element_type=jnp.float32)
        h = jnp.maximum(h + b1_ref[...], 0.0)                          # ReLU
        z = jnp.dot(h, w2_ref[...], preferred_element_type=jnp.float32)
        z = z + b2_ref[...]                                            # (2*TB, C)

        pool_sum = z[:tb] + z[tb:]
        out_ref[...] = jax.nn.sigmoid(pool_sum).astype(out_ref.dtype)


def _pick_batch_tile(b):
    """Batch tile: multiple of 8 when possible (keeps the (TB, C) output block
    legal without relying on 'full dim'), otherwise the whole batch."""
    return 8 if (b % 8 == 0) else b


def _pick_hw_tile(hw, tb, c, itemsize, budget_bytes):
    """Largest multiple of 8 that evenly divides hw and keeps a (tb, t, c)
    block under `budget_bytes`; falls back to the full axis if none exists."""
    bytes_per_row = max(1, tb * c * itemsize)
    max_t = min(hw, budget_bytes // bytes_per_row)
    max_t = (max_t // 8) * 8
    t = max_t
    while t >= 8:
        if hw % t == 0:
            return t
        t -= 8
    # TODO(synk): pad/mask partial HW tiles instead of falling back to one block.
    return hw


def channel_attention_gate(x, w1, b1, w2, b2, *, vmem_block_bytes=4 * 1024 * 1024):
    """x: (B, C, H, W). Returns the (B, C) sigmoid gate (the expensive part).
    Works for f32 or bf16 inputs; accumulation is always f32."""
    B, C, H, W = x.shape
    HW = H * W
    mid = w1.shape[1]

    # NCHW -> (B, HW, C) so channels are lane-dense inside the kernel.
    # TODO(synk): if the producer can emit NHWC directly this transpose is free.
    x_t = jnp.transpose(x.reshape(B, C, HW), (0, 2, 1))

    TB = _pick_batch_tile(B)
    THW = _pick_hw_tile(HW, TB, C, jnp.dtype(x.dtype).itemsize, vmem_block_bytes)
    grid = (B // TB, HW // THW)

    kernel = functools.partial(_channel_attention_kernel, inv_hw=1.0 / float(HW))

    return pl.pallas_call(
        kernel,
        out_shape=jax.ShapeDtypeStruct((B, C), x.dtype),
        grid_spec=pltpu.PrefetchScalarGridSpec(
            num_scalar_prefetch=0,
            grid=grid,
            in_specs=[
                pl.BlockSpec((TB, THW, C), lambda b, h: (b, h, 0)),   # x tile
                pl.BlockSpec((C, mid), lambda b, h: (0, 0)),          # w1
                pl.BlockSpec((1, mid), lambda b, h: (0, 0)),          # b1
                pl.BlockSpec((mid, C), lambda b, h: (0, 0)),          # w2
                pl.BlockSpec((1, C), lambda b, h: (0, 0)),            # b2
            ],
            out_specs=pl.BlockSpec((TB, C), lambda b, h: (b, 0)),
            scratch_shapes=[
                pltpu.VMEM((TB, C), jnp.float32),   # running sum
                pltpu.VMEM((TB, C), jnp.float32),   # running max
            ],
        ),
        compiler_params=pltpu.CompilerParams(
            dimension_semantics=("parallel", "arbitrary"),
            vmem_limit_bytes=32 * 1024 * 1024,
        ),
    )(x_t, w1, b1, w2, b2)


def channel_attention(x, w1, b1, w2, b2, **kw):
    """Module-parity output (B, C, H, W).  The broadcast is pure data movement;
    prefer consuming channel_attention_gate's (B, C) directly downstream."""
    B, C, H, W = x.shape
    gate = channel_attention_gate(x, w1, b1, w2, b2, **kw)
    return jnp.broadcast_to(gate[:, :, None, None], (B, C, H, W))


def init_params(key, n_channels_in, reduction_ratio):
    """nn.Linear-style init U(-1/sqrt(fan_in), 1/sqrt(fan_in)); weights stored
    transposed (fan_in, fan_out) so the kernel computes x @ W."""
    mid = int(n_channels_in / float(reduction_ratio))
    k1, k2, k3, k4 = jax.random.split(key, 4)
    bound1 = 1.0 / jnp.sqrt(jnp.float32(n_channels_in))
    bound2 = 1.0 / jnp.sqrt(jnp.float32(mid))
    w1 = jax.random.uniform(k1, (n_channels_in, mid), jnp.float32, -bound1, bound1)
    b1 = jax.random.uniform(k2, (1, mid), jnp.float32, -bound1, bound1)
    w2 = jax.random.uniform(k3, (mid, n_channels_in), jnp.float32, -bound2, bound2)
    b2 = jax.random.uniform(k4, (1, n_channels_in), jnp.float32, -bound2, bound2)
    return w1, b1, w2, b2


def reference(x, w1, b1, w2, b2):
    """Pure-JAX reference mirroring the PyTorch forward."""
    B, C, H, W = x.shape
    avg_pool = jnp.mean(x, axis=(2, 3))
    max_pool = jnp.max(x, axis=(2, 3))

    def bottleneck(v):
        h = jnp.maximum(v @ w1 + b1, 0.0)
        return h @ w2 + b2

    sig = jax.nn.sigmoid(bottleneck(avg_pool) + bottleneck(max_pool))
    return jnp.broadcast_to(sig[:, :, None, None], (B, C, H, W))


if __name__ == "__main__":
    B, C, H, W = 2, 4, 16, 16
    reduction_ratio = 2

    key = jax.random.PRNGKey(0)
    kx, kp = jax.random.split(key)
    x = jax.random.normal(kx, (B, C, H, W), dtype=jnp.float32)
    w1, b1, w2, b2 = init_params(kp, C, reduction_ratio)

    ref = reference(x, w1, b1, w2, b2)

    # 1) Default tile (single HW block at this toy size).
    out = channel_attention(x, w1, b1, w2, b2)
    out = jax.block_until_ready(out)
    assert out.shape == (B, C, H, W)
    assert jnp.allclose(out, ref, atol=1e-5, rtol=1e-5)

    # 2) Force a small HW tile so the grid / accumulator path is exercised
    #    (HW=256 -> THW=64 -> 4 reduction steps).
    out_tiled = channel_attention(x, w1, b1, w2, b2, vmem_block_bytes=2048)
    out_tiled = jax.block_until_ready(out_tiled)
    assert jnp.allclose(out_tiled, ref, atol=1e-5, rtol=1e-5)

    print("KERNEL_OK")
</pallas_src>

<mosaic_0001>
module attributes {stable_mosaic.version = 11 : i64} {
  func.func @_channel_attention_kernel(%arg0: i32, %arg1: i32, %arg2: memref<2x256x4xf32, #tpu.memory_space<vmem>>, %arg3: memref<4x2xf32, #tpu.memory_space<vmem>>, %arg4: memref<1x2xf32, #tpu.memory_space<vmem>>, %arg5: memref<2x4xf32, #tpu.memory_space<vmem>>, %arg6: memref<1x4xf32, #tpu.memory_space<vmem>>, %arg7: memref<2x4xf32, #tpu.memory_space<vmem>>, %arg8: memref<2x4xf32, #tpu.memory_space<vmem>>, %arg9: memref<2x4xf32, #tpu.memory_space<vmem>>) attributes {dimension_semantics = [#tpu.dimension_semantics<parallel>, #tpu.dimension_semantics<arbitrary>], iteration_bounds = array<i64: 1, 1>, scalar_prefetch = 0 : i64, scratch_operands = 2 : i64, tpu.core_type = #tpu.core_type<tc>, window_params = [{transform_indices = @transform_0, window_bounds = array<i64: 2, 256, 4>}, {pipeline_mode = #tpu.pipeline_mode<synchronous>, transform_indices = @transform_1, window_bounds = array<i64: 4, 2>}, {pipeline_mode = #tpu.pipeline_mode<synchronous>, transform_indices = @transform_2, window_bounds = array<i64: 1, 2>}, {pipeline_mode = #tpu.pipeline_mode<synchronous>, transform_indices = @transform_3, window_bounds = array<i64: 2, 4>}, {pipeline_mode = #tpu.pipeline_mode<synchronous>, transform_indices = @transform_4, window_bounds = array<i64: 1, 4>}, {transform_indices = @transform_5, window_bounds = array<i64: 2, 4>}]} {
    %c0_i32 = arith.constant 0 : i32
    %0 = arith.cmpi eq, %arg1, %c0_i32 : i32
    %1 = arith.extui %0 : i1 to i32
    %c0_i32_0 = arith.constant 0 : i32
    %2 = arith.cmpi ne, %1, %c0_i32_0 : i32
    scf.if %2 {
      %cst_14 = arith.constant 0.000000e+00 : f32
      %15 = vector.broadcast %cst_14 : f32 to vector<2x4xf32>
      %c0_15 = arith.constant 0 : index
      %c0_16 = arith.constant 0 : index
      %16 = vector.load %arg8[%c0_15, %c0_16] : memref<2x4xf32, #tpu.memory_space<vmem>>, vector<2x4xf32>
      tpu.vector_store %arg8[%c0_15, %c0_16], %15 {strides = array<i32>} : memref<2x4xf32, #tpu.memory_space<vmem>>, vector<2x4xf32>,
      %cst_17 = arith.constant 0xFF800000 : f32
      %17 = vector.broadcast %cst_17 : f32 to vector<2x4xf32>
      %c0_18 = arith.constant 0 : index
      %c0_19 = arith.constant 0 : index
      %18 = vector.load %arg9[%c0_18, %c0_19] : memref<2x4xf32, #tpu.memory_space<vmem>>, vector<2x4xf32>
      tpu.vector_store %arg9[%c0_18, %c0_19], %17 {strides = array<i32>} : memref<2x4xf32, #tpu.memory_space<vmem>>, vector<2x4xf32>,
    } else {
    }
    %c0 = arith.constant 0 : index
    %c0_1 = arith.constant 0 : index
    %c0_2 = arith.constant 0 : index
    %3 = vector.load %arg2[%c0, %c0_1, %c0_2] : memref<2x256x4xf32, #tpu.memory_space<vmem>>, vector<2x256x4xf32>
    %c0_3 = arith.constant 0 : index
    %c0_4 = arith.constant 0 : index
    %4 = vector.load %arg8[%c0_3, %c0_4] : memref<2x4xf32, #tpu.memory_space<vmem>>, vector<2x4xf32>
    %cst = arith.constant dense<0.000000e+00> : vector<2x4xf32>
    %5 = vector.multi_reduction <add>, %3, %cst [1] : vector<2x256x4xf32> to vector<2x4xf32>
    %6 = arith.addf %4, %5 : vector<2x4xf32>
    %c0_5 = arith.constant 0 : index
    %c0_6 = arith.constant 0 : index
    %7 = vector.load %arg8[%c0_5, %c0_6] : memref<2x4xf32, #tpu.memory_space<vmem>>, vector<2x4xf32>
    tpu.vector_store %arg8[%c0_5, %c0_6], %6 {strides = array<i32>} : memref<2x4xf32, #tpu.memory_space<vmem>>, vector<2x4xf32>,
    %c0_7 = arith.constant 0 : index
    %c0_8 = arith.constant 0 : index
    %8 = vector.load %arg9[%c0_7, %c0_8] : memref<2x4xf32, #tpu.memory_space<vmem>>, vector<2x4xf32>
    %cst_9 = arith.constant dense<0xFF800000> : vector<2x4xf32>
    %9 = vector.multi_reduction <maximumf>, %3, %cst_9 [1] : vector<2x256x4xf32> to vector<2x4xf32>
    %10 = arith.maximumf %8, %9 : vector<2x4xf32>
    %c0_10 = arith.constant 0 : index
    %c0_11 = arith.constant 0 : index
    %11 = vector.load %arg9[%c0_10, %c0_11] : memref<2x4xf32, #tpu.memory_space<vmem>>, vector<2x4xf32>
    tpu.vector_store %arg9[%c0_10, %c0_11], %10 {strides = array<i32>} : memref<2x4xf32, #tpu.memory_space<vmem>>, vector<2x4xf32>,
    %c0_i32_12 = arith.constant 0 : i32
    %12 = arith.cmpi eq, %arg1, %c0_i32_12 : i32
    %13 = arith.extui %12 : i1 to i32
    %c0_i32_13 = arith.constant 0 : i32
    %14 = arith.cmpi ne, %13, %c0_i32_13 : i32
    scf.if %14 {
      %c0_14 = arith.constant 0 : index
      %c0_15 = arith.constant 0 : index
      %15 = vector.load %arg8[%c0_14, %c0_15] : memref<2x4xf32, #tpu.memory_space<vmem>>, vector<2x4xf32>
      %cst_16 = arith.constant 3.906250e-03 : f32
      %16 = vector.broadcast %cst_16 : f32 to vector<2x4xf32>
      %17 = arith.mulf %15, %16 : vector<2x4xf32>
      %c0_17 = arith.constant 0 : index
      %c0_18 = arith.constant 0 : index
      %18 = vector.load %arg9[%c0_17, %c0_18] : memref<2x4xf32, #tpu.memory_space<vmem>>, vector<2x4xf32>
      %19 = tpu.concatenate %17, %18 in 0 : vector<2x4xf32>, vector<2x4xf32> -> vector<4x4xf32>
      %c0_19 = arith.constant 0 : index
      %c0_20 = arith.constant 0 : index
      %20 = vector.load %arg3[%c0_19, %c0_20] : memref<4x2xf32, #tpu.memory_space<vmem>>, vector<4x2xf32>
      %cst_21 = arith.constant dense<0.000000e+00> : vector<4x2xf32>
      %21 = tpu.matmul %19, %20, %cst_21 {dimension_numbers = #tpu.dot_dimension_numbers<[1], [0], [0], [1], [0, 0, 1, 1], [], []>} : vector<4x4xf32>, vector<4x2xf32>, vector<4x2xf32> -> vector<4x2xf32>
      %c0_22 = arith.constant 0 : index
      %c0_23 = arith.constant 0 : index
      %22 = vector.load %arg4[%c0_22, %c0_23] : memref<1x2xf32, #tpu.memory_space<vmem>>, vector<1x2xf32>
      %23 = vector.broadcast %22 : vector<1x2xf32> to vector<4x2xf32>
      %24 = arith.addf %21, %23 : vector<4x2xf32>
      %cst_24 = arith.constant 0.000000e+00 : f32
      %25 = vector.broadcast %cst_24 : f32 to vector<4x2xf32>
      %26 = arith.maximumf %24, %25 : vector<4x2xf32>
      %c0_25 = arith.constant 0 : index
      %c0_26 = arith.constant 0 : index
      %27 = vector.load %arg5[%c0_25, %c0_26] : memref<2x4xf32, #tpu.memory_space<vmem>>, vector<2x4xf32>
      %cst_27 = arith.constant dense<0.000000e+00> : vector<4x4xf32>
      %28 = tpu.matmul %26, %27, %cst_27 {dimension_numbers = #tpu.dot_dimension_numbers<[1], [0], [0], [1], [0, 0, 1, 1], [], []>} : vector<4x2xf32>, vector<2x4xf32>, vector<4x4xf32> -> vector<4x4xf32>
      %c0_28 = arith.constant 0 : index
      %c0_29 = arith.constant 0 : index
      %29 = vector.load %arg6[%c0_28, %c0_29] : memref<1x4xf32, #tpu.memory_space<vmem>>, vector<1x4xf32>
      %30 = vector.broadcast %29 : vector<1x4xf32> to vector<4x4xf32>
      %31 = arith.addf %28, %30 : vector<4x4xf32>
      %32 = vector.extract_strided_slice %31 {offsets = [0, 0], sizes = [2, 4], strides = [1, 1]} : vector<4x4xf32> to vector<2x4xf32>
      %33 = vector.extract_strided_slice %31 {offsets = [2, 0], sizes = [2, 4], strides = [1, 1]} : vector<4x4xf32> to vector<2x4xf32>
      %34 = arith.addf %32, %33 : vector<2x4xf32>
      %35 = arith.negf %34 : vector<2x4xf32>
      %36 = math.exp %35 : vector<2x4xf32>
      %cst_30 = arith.constant 1.000000e+00 : f32
      %37 = vector.broadcast %cst_30 : f32 to vector<2x4xf32>
      %38 = arith.addf %37, %36 : vector<2x4xf32>
      %39 = arith.divf %37, %38 : vector<2x4xf32>
      %c0_31 = arith.constant 0 : index
      %c0_32 = arith.constant 0 : index
      %40 = vector.load %arg7[%c0_31, %c0_32] : memref<2x4xf32, #tpu.memory_space<vmem>>, vector<2x4xf32>
      tpu.vector_store %arg7[%c0_31, %c0_32], %39 {strides = array<i32>} : memref<2x4xf32, #tpu.memory_space<vmem>>, vector<2x4xf32>,
    } else {
    }
    return
  }
  func.func @transform_0(%arg0: i32, %arg1: i32) -> (i32, i32, i32) {
    %c0_i32 = arith.constant 0 : i32
    %c0_i32_0 = arith.constant 0 : i32
    return %arg0, %arg1, %c0_i32 : i32, i32, i32
  }
  func.func @transform_1(%arg0: i32, %arg1: i32) -> (i32, i32) {
    %c0_i32 = arith.constant 0 : i32
    %c0_i32_0 = arith.constant 0 : i32
    %c0_i32_1 = arith.constant 0 : i32
    return %c0_i32, %c0_i32_0 : i32, i32
  }
  func.func @transform_2(%arg0: i32, %arg1: i32) -> (i32, i32) {
    %c0_i32 = arith.constant 0 : i32
    %c0_i32_0 = arith.constant 0 : i32
    %c0_i32_1 = arith.constant 0 : i32
    return %c0_i32, %c0_i32_0 : i32, i32
  }
  func.func @transform_3(%arg0: i32, %arg1: i32) -> (i32, i32) {
    %c0_i32 = arith.constant 0 : i32
    %c0_i32_0 = arith.constant 0 : i32
    %c0_i32_1 = arith.constant 0 : i32
    return %c0_i32, %c0_i32_0 : i32, i32
  }
  func.func @transform_4(%arg0: i32, %arg1: i32) -> (i32, i32) {
    %c0_i32 = arith.constant 0 : i32
    %c0_i32_0 = arith.constant 0 : i32
    %c0_i32_1 = arith.constant 0 : i32
    return %c0_i32, %c0_i32_0 : i32, i32
  }
  func.func @transform_5(%arg0: i32, %arg1: i32) -> (i32, i32) {
    %c0_i32 = arith.constant 0 : i32
    %c0_i32_0 = arith.constant 0 : i32
    return %arg0, %c0_i32 : i32, i32
  }
}

</mosaic_0001>

<bundles_post_ra>
// kernel: tpu_custom_call.1
= control target key start
LH: loop header
LB: loop body
LE: loop exit
PB: predicated region body
PF: predicated region fallthrough
CT: control target
= control target key end

     0   :  { %vm25_vm0 = vcmask 25600   ;;  %v1363_v3 = vmov 0.0   ;;  %v646_v4 = vmov -inf   ;;  %vm93_vm1 = vcmask 31744   ;;  %s1357_s0 = inlined_call_operand.vmem [shape: f32[2,256,4], index: 0, kind: input, shape index: {}]   ;;  %s1358_s1 = inlined_call_operand.vmem [shape: f32[4,2], index: 1, kind: input, shape index: {}]   ;;  %s1359_s2 = inlined_call_operand.vmem [shape: f32[1,2], index: 2, kind: input, shape index: {}]   ;;  %s1360_s3 = inlined_call_operand.vmem [shape: f32[2,4], index: 3, kind: input, shape index: {}]   ;;  %s1361_s4 = inlined_call_operand.vmem [shape: f32[1,4], index: 4, kind: input, shape index: {}]   ;;  %s1362_s5 = inlined_call_operand.hbm [shape: f32[2,4], index: 5, kind: output, shape index: {}]  }
   0x1   :  { %v682_v0 = vld [vmem:[%s1357_s0] sm:$0xff]  ;;  %v687_v1 = vld [vmem:[%s1357_s0 + $0x8] sm:$0xff]  ;;  %v692_v2 = vld [vmem:[%s1357_s0 + $0x10] sm:$0xff]  ;;  %26 = vst.msk [vmem:[#allocation2] sm:$0x3] %vm25_vm0, %v1363_v3  ;;  %603 = vmatprep.subr.mxu0 %v1363_v3  ;;  %608 = vmatprep.subr.mxu1 %v1363_v3  ;;  %vm407_vm2 = vcmask 1043456  }
   0x2   :  { %27 = vst.msk [vmem:[#allocation3] sm:$0x3] %vm25_vm0, %v646_v4  ;;  %v700_v5 = vld [vmem:[%s1357_s0 + $0x18] sm:$0xff]  ;;  %v94_v6 = vsel %vm93_vm1, %v682_v0, 0.0  ;;  %v95_v7 = vsel %vm93_vm1, %v687_v1, 0.0  ;;  %v97_v8 = vsel %vm93_vm1, %v692_v2, 0.0 }
   0x3   :  { %v713_v9 = vld [vmem:[%s1357_s0 + $0x20] sm:$0xff]  ;;  %v96_v10 = vadd.f32 %v95_v7, %v94_v6  ;;  %v718_v11 = vld [vmem:[%s1357_s0 + $0x28] sm:$0xff]  ;;  %v723_v12 = vld [vmem:[%s1357_s0 + $0x30] sm:$0xff]  ;;  %v99_v14 = vsel %vm93_vm1, %v700_v5, 0.0 }
   0x4   :  { %v728_v13 = vld [vmem:[%s1357_s0 + $0x38] sm:$0xff]  ;;  %v735_v15 = vld [vmem:[%s1357_s0 + $0x40] sm:$0xff]  ;;  %v740_v16 = vld [vmem:[%s1357_s0 + $0x48] sm:$0xff]  ;;  %v101_v22 = vsel %vm93_vm1, %v713_v9, 0.0  ;;  %v103_v27 = vsel %vm93_vm1, %v718_v11, 0.0  ;;  %v105_v31 = vsel %vm93_vm1, %v723_v12, 0.0 }
   0x5   :  { %v745_v17 = vld [vmem:[%s1357_s0 + $0x50] sm:$0xff]  ;;  %v98_v18 = vadd.f32 %v97_v8, %v96_v10  ;;  %v750_v19 = vld [vmem:[%s1357_s0 + $0x58] sm:$0xff]  ;;  %v755_v20 = vld [vmem:[%s1357_s0 + $0x60] sm:$0xff]  ;;  %v107_v32 = vsel %vm93_vm1, %v728_v13, 0.0  ;;  %v109_v33 = vsel %vm93_vm1, %v735_v15, 0.0  ;;  %v819_v38 = vsel %vm93_vm1, %v740_v16, 0.0 }
   0x6   :  { %v760_v21 = vld [vmem:[%s1357_s0 + $0x68] sm:$0xff]  ;;  %v767_v23 = vld [vmem:[%s1357_s0 + $0x70] sm:$0xff]  ;;  %v772_v24 = vld [vmem:[%s1357_s0 + $0x78] sm:$0xff]  ;;  %v823_v39 = vsel %vm93_vm1, %v745_v17, 0.0  ;;  %v827_v40 = vsel %vm93_vm1, %v750_v19, 0.0  ;;  %v846_v44 = vsel %vm93_vm1, %v755_v20, 0.0 }
   0x7   :  { %v777_v25 = vld [vmem:[%s1357_s0 + $0x80] sm:$0xff]  ;;  %v100_v26 = vadd.f32 %v99_v14, %v98_v18  ;;  %v784_v28 = vld [vmem:[%s1357_s0 + $0x88] sm:$0xff]  ;;  %v789_v29 = vld [vmem:[%s1357_s0 + $0x90] sm:$0xff]  ;;  %v850_v45 = vsel %vm93_vm1, %v760_v21, 0.0  ;;  %v854_v46 = vsel %vm93_vm1, %v767_v23, 0.0  ;;  %v873_v51 = vsel %vm93_vm1, %v772_v24, 0.0 }
   0x8   :  { %v794_v30 = vld [vmem:[%s1357_s0 + $0x98] sm:$0xff]  ;;  %v805_v34 = vld [vmem:[%s1357_s0 + $0xa0] sm:$0xff]  ;;  %v810_v35 = vld [vmem:[%s1357_s0 + $0xa8] sm:$0xff]  ;;  %v877_v52 = vsel %vm93_vm1, %v777_v25, 0.0  ;;  %v881_v53 = vsel %vm93_vm1, %v784_v28, 0.0  ;;  %v895_v56 = vsel %vm93_vm1, %v789_v29, 0.0 }
   0x9   :  { %v815_v36 = vld [vmem:[%s1357_s0 + $0xb0] sm:$0xff]  ;;  %v102_v37 = vadd.f32 %v101_v22, %v100_v26  ;;  %v832_v41 = vld [vmem:[%s1357_s0 + $0xb8] sm:$0xff]  ;;  %v837_v42 = vld [vmem:[%s1357_s0 + $0xc0] sm:$0xff]  ;;  %1391 = vst [vmem:[#allocation11_spill] sm:$0xff] %v895_v56  ;;  %v899_v57 = vsel %vm93_vm1, %v794_v30, 0.0  ;;  %v903_v58 = vsel %vm93_vm1, %v805_v34, 0.0 }
   0xa   :  { %v842_v43 = vld [vmem:[%s1357_s0 + $0x100] sm:$0xff]  ;;  %v859_v47 = vld [vmem:[%s1357_s0 + $0xc8] sm:$0xff]  ;;  %v869_v49 = vld [vmem:[%s1357_s0 + $0x110] sm:$0xff]  ;;  %1392 = vst [vmem:[#allocation12_spill] sm:$0xff] %v899_v57  ;;  %v924_v4 = vsel %vm93_vm1, %v810_v35, 0.0  ;;  %v947_v18 = vsel %vm93_vm1, %v815_v36, 0.0 }
   0xb   :  { %1387 = vst [vmem:[#allocation7_spill] sm:$0xff] %v842_v43  ;;  %v864_v48 = vld [vmem:[%s1357_s0 + $0x108] sm:$0xff]  ;;  %1389 = vst [vmem:[#allocation9_spill] sm:$0xff] %v869_v49  ;;  %v104_v50 = vadd.f32 %v103_v27, %v102_v37  ;;  %v886_v54 = vld [vmem:[%s1357_s0 + $0xd0] sm:$0xff]  ;;  %v163_v59 = vsel %vm93_vm1, %v842_v43, 0.0  ;;  %v166_v7 = vsel %vm93_vm1, %v869_v49, 0.0 }
   0xc   :  { %1388 = vst [vmem:[#allocation8_spill] sm:$0xff] %v864_v48  ;;  %v891_v55 = vld [vmem:[%s1357_s0 + $0x118] sm:$0xff]  ;;  %1393 = vst [vmem:[#allocation13_spill] sm:$0xff] %v903_v58  ;;  %v915_v61 = vld [vmem:[%s1357_s0 + $0xe0] sm:$0xff]  ;;  %v164_v6 = vsel %vm93_vm1, %v864_v48, 0.0  ;;  %v951_v22 = vsel %vm93_vm1, %v832_v41, 0.0 }
   0xd   :  { %1390 = vst [vmem:[#allocation10_spill] sm:$0xff] %v891_v55  ;;  %v910_v60 = vld [vmem:[%s1357_s0 + $0xd8] sm:$0xff]  ;;  %1394 = vst [vmem:[#allocation14_spill] sm:$0xff] %v915_v61  ;;  %v920_v62 = vld [vmem:[%s1357_s0 + $0xe8] sm:$0xff]  ;;  %v106_v63 = vadd.f32 %v105_v31, %v104_v50  ;;  %v955_v26 = vsel %vm93_vm1, %v837_v42, 0.0  ;;  %v165_v27 = vadd.f32 %v164_v6, %v163_v59  ;;  %v978_v59 = vsel %vm93_vm1, %v886_v54, 0.0 }
   0xe   :  { %1395 = vst [vmem:[#allocation15_spill] sm:$0xff] %v920_v62  ;;  %1396 = vst [vmem:[#allocation16_spill] sm:$0xff] %v924_v4  ;;  %v933_v8 = vld [vmem:[%s1357_s0 + $0x120] sm:$0xff]  ;;  %v938_v10 = vld [vmem:[%s1357_s0 + $0x128] sm:$0xff]  ;;  %v168_v6 = vsel %vm93_vm1, %v891_v55, 0.0 }
   0xf   :  { %1397 = vst [vmem:[#allocation17_spill] sm:$0xff] %v933_v8  ;;  %1398 = vst [vmem:[#allocation18_spill] sm:$0xff] %v938_v10  ;;  %v943_v14 = vld [vmem:[%s1357_s0 + $0x130] sm:$0xff]  ;;  %v960_v31 = vld [vmem:[%s1357_s0 + $0x138] sm:$0xff]  ;;  %v108_v3 = vadd.f32 %v107_v32, %v106_v63  ;;  %v167_v4 = vadd.f32 %v166_v7, %v165_v27  ;;  %v172_v7 = vsel %vm93_vm1, %v938_v10, 0.0 }
  0x10   :  { %1399 = vst [vmem:[#allocation19_spill] sm:$0xff] %v943_v14  ;;  %1400 = vst [vmem:[#allocation20_spill] sm:$0xff] %v947_v18  ;;  %v965_v37 = vld [vmem:[%s1357_s0 + $0x140] sm:$0xff]  ;;  %v970_v50 = vld [vmem:[%s1357_s0 + $0x148] sm:$0xff]  ;;  %v1007_v18 = vsel %vm93_vm1, %v920_v62, 0.0  ;;  %v174_v27 = vsel %vm93_vm1, %v943_v14, 0.0 }
  0x11   :  { %1401 = vst [vmem:[#allocation21_spill] sm:$0xff] %v951_v22  ;;  %1402 = vst [vmem:[#allocation22_spill] sm:$0xff] %v955_v26  ;;  %v974_v26 = vsel %vm93_vm1, %v859_v47, 0.0  ;;  %v985_v22 = vld [vmem:[%s1357_s0 + $0x150] sm:$0xff]  ;;  %v990_v32 = vld [vmem:[%s1357_s0 + $0x158] sm:$0xff]  ;;  %v176_v10 = vsel %vm93_vm1, %v960_v31, 0.0 }
  0x12   :  { %1403 = vst [vmem:[#allocation23_spill] sm:$0xff] %v960_v31  ;;  %1404 = vst [vmem:[#allocation24_spill] sm:$0xff] %v965_v37  ;;  %v995_v63 = vld [vmem:[%s1357_s0 + $0x160] sm:$0xff]  ;;  %v1012_v58 = vld [vmem:[%s1357_s0 + $0x168] sm:$0xff]  ;;  %v178_v14 = vsel %vm93_vm1, %v965_v37, 0.0  ;;  %v184_v37 = vsel %vm93_vm1, %v990_v32, 0.0 }
  0x13   :  { %1405 = vst [vmem:[#allocation25_spill] sm:$0xff] %v970_v50  ;;  %1406 = vst [vmem:[#allocation26_spill] sm:$0xff] %v974_v26  ;;  %v1003_v26 = vsel %vm93_vm1, %v915_v61, 0.0  ;;  %v1017_v55 = vld [vmem:[%s1357_s0 + $0x170] sm:$0xff]  ;;  %v1033_v49 = vld [vmem:[%s1357_s0 + $0x180] sm:$0xff]  ;;  %v1073_v31 = vsel %vm93_vm1, %v995_v63, 0.0 }
  0x14   :  { %1407 = vst [vmem:[#allocation27_spill] sm:$0xff] %v978_v59  ;;  %1408 = vst [vmem:[#allocation28_spill] sm:$0xff] %v990_v32  ;;  %v999_v59 = vsel %vm93_vm1, %v910_v60, 0.0  ;;  %v1038_v48 = vld [vmem:[%s1357_s0 + $0x188] sm:$0xff]  ;;  %v1054_v57 = vld [vmem:[%s1357_s0 + $0x198] sm:$0xff]  ;;  %v1082_v61 = vsel %vm93_vm1, %v1012_v58, 0.0 }
  0x15   :  { %1409 = vst [vmem:[#allocation29_spill] sm:$0xff] %v995_v63  ;;  %1410 = vst [vmem:[#allocation30_spill] sm:$0xff] %v999_v59  ;;  %v1022_v59 = vld [vmem:[%s1357_s0 + $0x178] sm:$0xff]  ;;  %v1059_v43 = vld [vmem:[%s1357_s0 + $0x1a0] sm:$0xff]  ;;  %v1095_v32 = vsel %vm93_vm1, %v1033_v49, 0.0 }
  0x16   :  { %1411 = vst [vmem:[#allocation31_spill] sm:$0xff] %v1003_v26  ;;  %1412 = vst [vmem:[#allocation32_spill] sm:$0xff] %v1007_v18  ;;  %v110_v26 = vadd.f32 %v109_v33, %v108_v3  ;;  %v170_v18 = vsel %vm93_vm1, %v933_v8, 0.0  ;;  %v1043_v3 = vld [vmem:[%s1357_s0 + $0x190] sm:$0xff]  ;;  %v169_v33 = vadd.f32 %v168_v6, %v167_v4  ;;  %v180_v8 = vsel %vm93_vm1, %v970_v50, 0.0  ;;  %v1064_v4 = vld [vmem:[%s1357_s0 + $0x1a8] sm:$0xff] }
  0x17   :  { %1413 = vst [vmem:[#allocation33_spill] sm:$0xff] %v1012_v58  ;;  %1414 = vst [vmem:[#allocation34_spill] sm:$0xff] %v1017_v55  ;;  %v182_v50 = vsel %vm93_vm1, %v985_v22, 0.0  ;;  %v1078_v62 = vld [vmem:[%s1357_s0 + $0x1b0] sm:$0xff]  ;;  %v1107_v58 = vsel %vm93_vm1, %v1054_v57, 0.0 }
  0x18   :  { %1415 = vst [vmem:[#allocation35_spill] sm:$0xff] %v1033_v49  ;;  %1416 = vst [vmem:[#allocation36_spill] sm:$0xff] %v1038_v48  ;;  %v112_v6 = vadd.f32 %v819_v38, %v110_v26  ;;  %v171_v56 = vadd.f32 %v170_v18, %v169_v33  ;;  %v1086_v38 = vsel %vm93_vm1, %v1017_v55, 0.0  ;;  %v1090_v26 = vsel %vm93_vm1, %v1022_v59, 0.0 }
  0x19   :  { %1417 = vst [vmem:[#allocation37_spill] sm:$0xff] %v1054_v57  ;;  %1418 = vst [vmem:[#allocation38_spill] sm:$0xff] %v1059_v43  ;;  %v1099_v18 = vsel %vm93_vm1, %v1038_v48, 0.0  ;;  %v1103_v33 = vsel %vm93_vm1, %v1043_v3, 0.0  ;;  %v1120_v49 = vsel %vm93_vm1, %v1078_v62, 0.0 }
  0x1a   :  { %1419 = vst [vmem:[#allocation39_spill] sm:$0xff] %v1064_v4  ;;  %1420 = vst [vmem:[#allocation40_spill] sm:$0xff] %v1078_v62  ;;  %v114_v63 = vadd.f32 %v823_v39, %v112_v6  ;;  %v173_v55 = vadd.f32 %v172_v7, %v171_v56  ;;  %v1111_v39 = vsel %vm93_vm1, %v1059_v43, 0.0  ;;  %v1115_v6 = vsel %vm93_vm1, %v1064_v4, 0.0  ;;  %v396_v43 = vld [vmem:[%s1358_s1] sm:$0xf] }
  0x1b   :  { %1421 = vst [vmem:[#allocation41_spill] sm:$0xff] %v1120_v49  ;;  %v241_v56 = vsel %vm93_vm1, %v682_v0, -inf  ;;  %v242_v7 = vsel %vm93_vm1, %v687_v1, -inf  ;;  %v243_v4 = vsel %vm93_vm1, %v692_v2, -inf  ;;  %604 = vmatpush3.msk.msra.mxu0 %vm407_vm2, %v396_v43  ;;  %v249_v49 = vsel %vm93_vm1, %v718_v11, -inf }
  0x1c   :  { %v116_v48 = vadd.f32 %v827_v40, %v114_v63  ;;  %v175_v57 = vadd.f32 %v174_v27, %v173_v55  ;;  %v245_v40 = vsel %vm93_vm1, %v700_v5, -inf  ;;  %v247_v63 = vsel %vm93_vm1, %v713_v9, -inf }
  0x1d   :  { %v244_v62 = vmax.f32 %v241_v56, %v243_v4  ;;  %v246_v1 = vmax.f32 %v242_v7, %v245_v40 }
  0x1e   :  { %v118_v0 = vadd.f32 %v846_v44, %v116_v48 }
  0x1f   :  { %10 = vsyncpa [#allocation5], 0  ;;  %v177_v55 = vadd.f32 %v176_v10, %v175_v57  ;;  %v251_v2 = vsel %vm93_vm1, %v723_v12, -inf  ;;  %v253_v5 = vsel %vm93_vm1, %v728_v13, -inf  ;;  %v255_v9 = vsel %vm93_vm1, %v735_v15, -inf }
  0x20   :  { %v120_v43 = vadd.f32 %v850_v45, %v118_v0  ;;  %v248_v27 = vmax.f32 %v244_v62, %v247_v63  ;;  %v250_v44 = vmax.f32 %v246_v1, %v249_v49  ;;  %v257_v48 = vsel %vm93_vm1, %v740_v16, -inf  ;;  %v1422_v0 = vld [vmem:[#allocation14_spill] sm:$0xff] }
  0x21   :  { %v179_v4 = vadd.f32 %v178_v14, %v177_v55  ;;  %v259_v11 = vsel %vm93_vm1, %v745_v17, -inf  ;;  %v261_v12 = vsel %vm93_vm1, %v750_v19, -inf  ;;  %v263_v13 = vsel %vm93_vm1, %v755_v20, -inf  ;;  %v1423_v55 = vld [vmem:[#allocation11_spill] sm:$0xff] }
  0x22   :  { %v122_v57 = vadd.f32 %v854_v46, %v120_v43  ;;  %v252_v15 = vmax.f32 %v248_v27, %v251_v2  ;;  %v254_v10 = vmax.f32 %v250_v44, %v253_v5  ;;  %v265_v45 = vsel %vm93_vm1, %v760_v21, -inf  ;;  %v1426_v44 = vld [vmem:[#allocation12_spill] sm:$0xff] }
  0x23   :  { %v181_v49 = vadd.f32 %v180_v8, %v179_v4  ;;  %v267_v16 = vsel %vm93_vm1, %v767_v23, -inf  ;;  %v269_v17 = vsel %vm93_vm1, %v772_v24, -inf  ;;  %v271_v19 = vsel %vm93_vm1, %v777_v25, -inf }
  0x24   :  { %v124_v62 = vadd.f32 %v873_v51, %v122_v57  ;;  %v256_v20 = vmax.f32 %v252_v15, %v255_v9  ;;  %v258_v14 = vmax.f32 %v254_v10, %v257_v48  ;;  %v273_v46 = vsel %vm93_vm1, %v784_v28, -inf  ;;  %v1424_v9 = vld [vmem:[#allocation15_spill] sm:$0xff]  ;;  %v1428_v57 = vld [vmem:[#allocation9_spill] sm:$0xff]  ;;  %v1429_v10 = vld [vmem:[#allocation10_spill] sm:$0xff] }
  0x25   :  { %v183_v56 = vadd.f32 %v182_v50, %v181_v49  ;;  %v275_v21 = vsel %vm93_vm1, %v789_v29, -inf  ;;  %v277_v23 = vsel %vm93_vm1, %v794_v30, -inf  ;;  %v279_v24 = vsel %vm93_vm1, %v805_v34, -inf  ;;  %v1184_v34 = vld [vmem:[%s1357_s0 + $0xf0] sm:$0xff] }
  0x26   :  { %v126_v8 = vadd.f32 %v877_v52, %v124_v62  ;;  %v260_v25 = vmax.f32 %v256_v20, %v259_v11  ;;  %v262_v7 = vmax.f32 %v258_v14, %v261_v12  ;;  %v281_v51 = vsel %vm93_vm1, %v810_v35, -inf  ;;  %v1189_v52 = vld [vmem:[%s1357_s0 + $0xf8] sm:$0xff]  ;;  %v1427_v12 = vld [vmem:[#allocation8_spill] sm:$0xff] }
  0x27   :  { %v185_v40 = vadd.f32 %v184_v37, %v183_v56  ;;  %v283_v28 = vsel %vm93_vm1, %v815_v36, -inf  ;;  %v285_v29 = vsel %vm93_vm1, %v832_v41, -inf  ;;  %v287_v30 = vsel %vm93_vm1, %v837_v42, -inf  ;;  %v1430_v49 = vld [vmem:[#allocation17_spill] sm:$0xff] }
  0x28   :  { %v128_v35 = vadd.f32 %v881_v53, %v126_v8  ;;  %v264_v37 = vmax.f32 %v260_v25, %v263_v13  ;;  %v266_v36 = vmax.f32 %v262_v7, %v265_v45  ;;  %v289_v41 = vsel %vm93_vm1, %v859_v47, -inf  ;;  %v1432_v8 = vld [vmem:[#allocation18_spill] sm:$0xff]  ;;  %v1433_v25 = vld [vmem:[#allocation19_spill] sm:$0xff] }
  0x29   :  { %v187_v50 = vadd.f32 %v1073_v31, %v185_v40  ;;  %v291_v42 = vsel %vm93_vm1, %v886_v54, -inf  ;;  %v293_v63 = vsel %vm93_vm1, %v910_v60, -inf  ;;  %v295_v1 = vsel %vm93_vm1, %v1422_v0, -inf  ;;  %v1425_v60 = vld [vmem:[#allocation7_spill] sm:$0xff]  ;;  %v1434_v40 = vld [vmem:[#allocation16_spill] sm:$0xff] }
  0x2a   :  { %v130_v2 = vadd.f32 %v1423_v55, %v128_v35  ;;  %v268_v5 = vmax.f32 %v264_v37, %v267_v16  ;;  %v270_v53 = vmax.f32 %v266_v36, %v269_v17  ;;  %v297_v43 = vsel %vm93_vm1, %v1424_v9, -inf  ;;  %v1431_v17 = vld [vmem:[#allocation13_spill] sm:$0xff] }
  0x2b   :  { %v189_v47 = vadd.f32 %v1082_v61, %v187_v50  ;;  %v1207_v31 = vsel %vm93_vm1, %v1184_v34, -inf  ;;  %v1211_v54 = vsel %vm93_vm1, %v1189_v52, -inf  ;;  %v310_v27 = vsel %vm93_vm1, %v1425_v60, -inf }
  0x2c   :  { %v132_v48 = vadd.f32 %v1426_v44, %v130_v2  ;;  %v272_v4 = vmax.f32 %v268_v5, %v271_v19  ;;  %v274_v11 = vmax.f32 %v270_v53, %v273_v46  ;;  %v311_v13 = vsel %vm93_vm1, %v1427_v12, -inf  ;;  %v1436_v2 = vld [vmem:[#allocation24_spill] sm:$0xff] }
  0x2d   :  { %v191_v61 = vadd.f32 %v1086_v38, %v189_v47  ;;  %v312_v15 = vsel %vm93_vm1, %v1428_v57, -inf  ;;  %v314_v45 = vsel %vm93_vm1, %v1429_v10, -inf  ;;  %v316_v16 = vsel %vm93_vm1, %v1430_v49, -inf  ;;  %v1437_v5 = vld [vmem:[#allocation20_spill] sm:$0xff]  ;;  %v1442_v10 = vld [vmem:[#allocation22_spill] sm:$0xff] }
  0x2e   :  { %v134_v62 = vadd.f32 %v1431_v17, %v132_v48  ;;  %v276_v20 = vmax.f32 %v272_v4, %v275_v21  ;;  %v278_v14 = vmax.f32 %v274_v11, %v277_v23  ;;  %v313_v19 = vmax.f32 %v310_v27, %v312_v15  ;;  %v1435_v21 = vld [vmem:[#allocation23_spill] sm:$0xff]  ;;  %v1439_v48 = vld [vmem:[#allocation21_spill] sm:$0xff] }
  0x2f   :  { %v193_v46 = vadd.f32 %v1090_v26, %v191_v61  ;;  %v315_v56 = vmax.f32 %v311_v13, %v314_v45  ;;  %v318_v38 = vsel %vm93_vm1, %v1432_v8, -inf  ;;  %v320_v7 = vsel %vm93_vm1, %v1433_v25, -inf  ;;  %v1441_v15 = vld [vmem:[#allocation29_spill] sm:$0xff]  ;;  %v1446_v25 = vld [vmem:[#allocation35_spill] sm:$0xff] }
  0x30   :  { %v136_v35 = vadd.f32 %v1434_v40, %v134_v62  ;;  %v280_v37 = vmax.f32 %v276_v20, %v279_v24  ;;  %v282_v36 = vmax.f32 %v278_v14, %v281_v51  ;;  %v317_v50 = vmax.f32 %v313_v19, %v316_v16  ;;  %v1438_v24 = vld [vmem:[#allocation25_spill] sm:$0xff]  ;;  %v1444_v20 = vld [vmem:[#allocation34_spill] sm:$0xff]  ;;  %v1447_v40 = vld [vmem:[#allocation27_spill] sm:$0xff] }
  0x31   :  { %v195_v0 = vadd.f32 %v1095_v32, %v193_v46  ;;  %v319_v55 = vmax.f32 %v315_v56, %v318_v38  ;;  %v322_v23 = vsel %vm93_vm1, %v1435_v21, -inf  ;;  %v324_v26 = vsel %vm93_vm1, %v1436_v2, -inf  ;;  %v1445_v14 = vld [vmem:[#allocation26_spill] sm:$0xff] }
  0x32   :  { %v138_v53 = vadd.f32 %v1437_v5, %v136_v35  ;;  %v284_v9 = vmax.f32 %v280_v37, %v283_v28  ;;  %v286_v47 = vmax.f32 %v282_v36, %v285_v29  ;;  %v321_v60 = vmax.f32 %v317_v50, %v320_v7  ;;  %v1440_v28 = vld [vmem:[#allocation28_spill] sm:$0xff]  ;;  %v84_v36 = vld [vmem:[%s1357_s0 + $0x1c0] sm:$0xff] }
  0x33   :  { %v197_v27 = vadd.f32 %v1099_v18, %v195_v0  ;;  %v323_v44 = vmax.f32 %v319_v55, %v322_v23  ;;  %v326_v51 = vsel %vm93_vm1, %v1438_v24, -inf  ;;  %v328_v32 = vsel %vm93_vm1, %v985_v22, -inf  ;;  %v1448_v0 = vld [vmem:[#allocation36_spill] sm:$0xff]  ;;  %v1449_v21 = vld [vmem:[#allocation30_spill] sm:$0xff] }
  0x34   :  { %v140_v4 = vadd.f32 %v1439_v48, %v138_v53  ;;  %v288_v11 = vmax.f32 %v284_v9, %v287_v30  ;;  %v290_v12 = vmax.f32 %v286_v47, %v289_v41  ;;  %v325_v13 = vmax.f32 %v321_v60, %v324_v26  ;;  %v1443_v30 = vld [vmem:[#allocation33_spill] sm:$0xff]  ;;  %v85_v5 = vld [vmem:[%s1357_s0 + $0x1c8] sm:$0xff]  ;;  %v1452_v60 = vld [vmem:[#allocation38_spill] sm:$0xff] }
  0x35   :  { %v199_v61 = vadd.f32 %v1103_v33, %v197_v27  ;;  %v327_v57 = vmax.f32 %v323_v44, %v326_v51  ;;  %v330_v29 = vsel %vm93_vm1, %v1440_v28, -inf  ;;  %v332_v18 = vsel %vm93_vm1, %v1441_v15, -inf  ;;  %v1451_v53 = vld [vmem:[#allocation41_spill] sm:$0xff]  ;;  %v1453_v27 = vld [vmem:[#allocation31_spill] sm:$0xff] }
  0x36   :  { %v142_v45 = vadd.f32 %v1442_v10, %v140_v4  ;;  %v292_v49 = vmax.f32 %v288_v11, %v291_v42  ;;  %v294_v16 = vmax.f32 %v290_v12, %v293_v63  ;;  %v329_v17 = vmax.f32 %v325_v13, %v328_v32  ;;  %v83_v42 = vld [vmem:[%s1357_s0 + $0x1b8] sm:$0xff]  ;;  %v1454_v32 = vld [vmem:[#allocation39_spill] sm:$0xff]  ;;  %v86_v4 = vld [vmem:[%s1357_s0 + $0x1d0] sm:$0xff] }
  0x37   :  { %v201_v22 = vadd.f32 %v1107_v58, %v199_v61  ;;  %v331_v62 = vmax.f32 %v327_v57, %v330_v29  ;;  %v334_v41 = vsel %vm93_vm1, %v1443_v30, -inf  ;;  %v336_v33 = vsel %vm93_vm1, %v1444_v20, -inf  ;;  %v1455_v13 = vld [vmem:[#allocation40_spill] sm:$0xff]  ;;  %v87_v10 = vld [vmem:[%s1357_s0 + $0x1d8] sm:$0xff]  ;;  %v88_v20 = vld [vmem:[%s1357_s0 + $0x1e0] sm:$0xff] }
  0x38   :  { %v144_v19 = vadd.f32 %v1445_v14, %v142_v45  ;;  %v296_v46 = vmax.f32 %v292_v49, %v295_v1  ;;  %v298_v56 = vmax.f32 %v294_v16, %v297_v43  ;;  %v333_v8 = vmax.f32 %v329_v17, %v332_v18  ;;  %v1456_v57 = vld [vmem:[#allocation32_spill] sm:$0xff] }
  0x39   :  { %v203_v63 = vadd.f32 %v1111_v39, %v201_v22  ;;  %v335_v38 = vmax.f32 %v331_v62, %v334_v41  ;;  %v338_v58 = vsel %vm93_vm1, %v1022_v59, -inf  ;;  %v340_v7 = vsel %vm93_vm1, %v1446_v25, -inf }
  0x3a   :  { %v146_v35 = vadd.f32 %v1447_v40, %v144_v19  ;;  %v300_v37 = vmax.f32 %v296_v46, %v1207_v31  ;;  %v302_v1 = vmax.f32 %v298_v56, %v1211_v54  ;;  %v337_v43 = vmax.f32 %v333_v8, %v336_v33  ;;  %v1450_v54 = vld [vmem:[#allocation37_spill] sm:$0xff]  ;;  %v89_v33 = vld [vmem:[%s1357_s0 + $0x1e8] sm:$0xff] }
  0x3b   :  { %v205_v39 = vadd.f32 %v1115_v6, %v203_v63  ;;  %v339_v50 = vmax.f32 %v335_v38, %v338_v58  ;;  %v342_v59 = vsel %vm93_vm1, %v1448_v0, -inf  ;;  %v344_v55 = vsel %vm93_vm1, %v1043_v3, -inf  ;;  %v90_v56 = vld [vmem:[%s1357_s0 + $0x1f0] sm:$0xff]  ;;  %v91_v58 = vld [vmem:[%s1357_s0 + $0x1f8] sm:$0xff] }
  0x3c   :  { %v148_v23 = vadd.f32 %v1449_v21, %v146_v35  ;;  %v208_v31 = vsel %vm93_vm1, %v83_v42, 0.0  ;;  %v341_v2 = vmax.f32 %v337_v43, %v340_v7  ;;  %v346_v26 = vsel %vm93_vm1, %v1450_v54, -inf }
  0x3d   :  { %v153_v6 = vsel %vm93_vm1, %v1184_v34, 0.0  ;;  %v207_v9 = vadd.f32 %v1451_v53, %v205_v39  ;;  %v343_v47 = vmax.f32 %v339_v50, %v342_v59  ;;  %v348_v3 = vsel %vm93_vm1, %v1452_v60, -inf }
  0x3e   :  { %v150_v44 = vadd.f32 %v1453_v27, %v148_v23  ;;  %v210_v24 = vsel %vm93_vm1, %v84_v36, 0.0  ;;  %v345_v51 = vmax.f32 %v341_v2, %v344_v55  ;;  %v350_v48 = vsel %vm93_vm1, %v1454_v32, -inf }
  0x3f   :  { %v209_v11 = vadd.f32 %v208_v31, %v207_v9  ;;  %v303_v34 = vmax.f32 %v300_v37, %v302_v1  ;;  %v347_v12 = vmax.f32 %v343_v47, %v346_v26  ;;  %v352_v61 = vsel %vm93_vm1, %v1455_v13, -inf }
  0x40   :  { %v152_v28 = vadd.f32 %v1456_v57, %v150_v44  ;;  %v212_v29 = vsel %vm93_vm1, %v85_v5, 0.0  ;;  %v349_v15 = vmax.f32 %v345_v51, %v348_v3  ;;  %v354_v18 = vsel %vm93_vm1, %v83_v42, -inf }
  0x41   :  { %v155_v45 = vsel %vm93_vm1, %v1189_v52, 0.0  ;;  %v211_v49 = vadd.f32 %v210_v24, %v209_v11  ;;  %v351_v16 = vmax.f32 %v347_v12, %v350_v48  ;;  %v356_v17 = vsel %vm93_vm1, %v84_v36, -inf }
  0x42   :  { %v154_v22 = vadd.f32 %v153_v6, %v152_v28  ;;  %v214_v62 = vsel %vm93_vm1, %v86_v4, 0.0  ;;  %v353_v30 = vmax.f32 %v349_v15, %v352_v61  ;;  %v358_v41 = vsel %vm93_vm1, %v85_v5, -inf }
  0x43   :  { %v213_v14 = vadd.f32 %v212_v29, %v211_v49  ;;  %v304_v52 = vrot.slane %v303_v34, 4  ;;  %v355_v19 = vmax.f32 %v351_v16, %v354_v18  ;;  %v360_v46 = vsel %vm93_vm1, %v86_v4, -inf  ;;  %v92_v16 = vld [vmem:[#allocation2] sm:$0x3] }
  0x44   :  { %v156_v8 = vadd.f32 %v155_v45, %v154_v22  ;;  %v216_v42 = vsel %vm93_vm1, %v87_v10, 0.0  ;;  %v357_v63 = vmax.f32 %v353_v30, %v356_v17  ;;  %v362_v38 = vsel %vm93_vm1, %v87_v10, -inf  ;;  %v240_v45 = vld [vmem:[#allocation3] sm:$0x3] }
  0x45   :  { %v215_v25 = vadd.f32 %v214_v62, %v213_v14  ;;  %v359_v7 = vmax.f32 %v355_v19, %v358_v41  ;;  %v364_v40 = vsel %vm93_vm1, %v88_v20, -inf  ;;  %v218_v37 = vsel %vm93_vm1, %v88_v20, 0.0 }
  0x46   :  { %v157_v35 = vrot.slane %v156_v8, 4  ;;  %v361_v1 = vmax.f32 %v357_v63, %v360_v46  ;;  %v366_v43 = vsel %vm93_vm1, %v89_v33, -inf  ;;  %vm647_vm3 = vmmov 0   ;;  %v482_v46 = vld [vmem:[%s1360_s3] sm:$0x3] }
  0x47   :  { %v1457_v36 = vmov 0.0   ;;  %v217_v39 = vadd.f32 %v216_v42, %v215_v25  ;;  %v305_v50 = vmax.f32 %v303_v34, %v304_v52  ;;  %v363_v0 = vmax.f32 %v359_v7, %v362_v38 }
  0x48   :  { %605 = vmatprep.mubr.msk.f32.mxu0 %vm647_vm3, %v1457_v36  ;;  %610 = vmatprep.mubr.msk.f32.mxu1 %vm647_vm3, %v1457_v36  ;;  %v368_v59 = vsel %vm93_vm1, %v90_v56, -inf  ;;  %v220_v55 = vsel %vm93_vm1, %v89_v33, 0.0  ;;  %v365_v21 = vmax.f32 %v361_v1, %v364_v40  ;;  %v370_v23 = vsel %vm93_vm1, %v91_v58, -inf }
  0x49   :  { %v158_v31 = vadd.f32 %v157_v35, %v156_v8  ;;  %v219_v2 = vadd.f32 %v218_v37, %v217_v39  ;;  %v367_v54 = vmax.f32 %v363_v0, %v366_v43  ;;  %v222_v26 = vsel %vm93_vm1, %v90_v56, 0.0  ;;  %v592_v56 = vld [vmem:[%s1359_s2] ss:$0 sm:$0xff]  ;;  %s648_s2 = smov [#allocation4]  }
  0x4a   :  { %v369_v5 = vmax.f32 %v365_v21, %v368_v59  ;;  %v306_v53 = vrot.slane %v305_v50, 2  ;;  %v224_v47 = vsel %vm93_vm1, %v91_v58, 0.0  ;;  %vm234_vm4 = vcmask 1041409   ;;  %v595_v58 = vld [vmem:[%s1361_s4] ss:$0 sm:$0xff]  ;;  %s584_s3 = sshll.u32 %s648_s2, 4  ;;  %s585_s3 = int_to_ptr.vmem [resolvable:$true] %s584_s3 }
  0x4b   :  { %v221_v6 = vadd.f32 %v220_v55, %v219_v2  ;;  %v371_v9 = vmax.f32 %v367_v54, %v370_v23  ;;  %v159_v60 = vrot.slane %v158_v31, 2  ;;  %vm394_vm5 = vcmask 1041408   ;;  %s621_s26 = scalar_lea.vmem %s585_s3, 32  ;;  %p626_p1 = scmp.lt.s32.totalorder %s585_s3, %s585_s3 }
  0x4c   :  { %v307_v24 = vmax.f32 %v305_v50, %v306_v53  ;;  %609 = vmatpush3.msk.msra.mxu1 %vm394_vm5, %v482_v46  ;;  %vm490_vm6 = vcmask 15360   ;;  %p622_p0 = scmp.ne.s32.totalorder %s585_s3, %s621_s26  ;;  %p627_p2 = scmp.lt.s32.totalorder %s621_s26, %s621_s26 }
  0x4d   :  { %v223_v3 = vadd.f32 %v222_v26, %v221_v6  ;;  %v372_v27 = vmax.f32 %v369_v5, %v371_v9  ;;  %v160_v32 = vadd.f32 %v159_v60, %v158_v31 }
  0x4e   :  { %v308_v34 = vrot.slane %v307_v24, 1  ;;  %p628_p3 = por %p627_p2, %p626_p1 }
  0x4f   :  { %v225_v44 = vadd.f32 %v224_v47, %v223_v3  ;;  %v373_v51 = vrot.slane %v372_v27, 4  ;;  %v161_v13 = vrot.slane %v160_v32, 1 }
  0x50   :  { %v309_v29 = vmax.f32 %v307_v24, %v308_v34  ;;  %p629_p4 = pnand %p628_p3, %p622_p0 }
  0x51   :  { %v226_v48 = vrot.slane %v225_v44, 4  ;;  %v374_v4 = vmax.f32 %v372_v27, %v373_v51  ;;  %v162_v18 = vadd.f32 %v161_v13, %v160_v32 }
  0x53   :  { %v227_v11 = vadd.f32 %v226_v48, %v225_v44  ;;  %v375_v12 = vrot.slane %v374_v4, 2 }
  0x55   :  { %v228_v61 = vrot.slane %v227_v11, 2  ;;  %v376_v57 = vmax.f32 %v374_v4, %v375_v12 }
  0x57   :  { %v229_v28 = vadd.f32 %v228_v61, %v227_v11  ;;  %v377_v15 = vrot.slane %v376_v57, 1 }
  0x59   :  { %v230_v10 = vrot.slane %v229_v28, 1  ;;  %v378_v49 = vmax.f32 %v376_v57, %v377_v15 }
  0x5b   :  { %v231_v17 = vadd.f32 %v230_v10, %v229_v28  ;;  %v381_v22 = vsel %vm234_vm4, %v378_v49, %v309_v29 }
  0x5c   :  { %v383_v62 = vmax.f32 %v240_v45, %v381_v22 }
  0x5d   :  { %v235_v30 = vsel %vm234_vm4, %v231_v17, %v162_v18 }
  0x5e   :  { %v237_v41 = vadd.f32 %v235_v30, %v92_v16  ;;  %384 = vst.msk [vmem:[#allocation3] sm:$0x3] %vm25_vm0, %v383_v62 }
  0x60   :  { %239 = vst.msk [vmem:[#allocation2] sm:$0x3] %vm25_vm0, %v237_v41 }
  0x65   :  { %v390_v20 = vld [vmem:[#allocation3] sm:$0x3] }
  0x66   :  { %v392_v33 = vrot.slane %v390_v20, 6 }
  0x67   :  { %v388_v14 = vld [vmem:[#allocation2] sm:$0x3] }
  0x68   :  { %v389_v52 = vmul.f32 0.00390625, %v388_v14 }
  0x6a   :  { %v395_v19 = vsel %vm394_vm5, %v389_v52, %v392_v33 }
  0x6b   :  { %606 = vmatmul.mubr.msk.f32.vlgmr.msra.gmra.mrb[0].mxu0 %vm93_vm1, %v395_v19 }
 0x13e   :  { %v477_v8 = vpop.f32.mrb[0].mxu0 }
 0x13f   :  { %v478_v42 = vadd.f32 %v592_v56, %v477_v8  ;;  %v607_v63 = vpop.f32.mrb[1].mxu0 }
 0x141   :  { %v481_v38 = vmax.f32 %v478_v42, 0.0 }
 0x143   :  { %611 = vmatmul.mubr.msk.f32.vlgmr.msra.gmra.mrb[0].mxu1 %vm490_vm6, %v481_v38 }
 0x216   :  { %v563_v25 = vpop.f32.mrb[0].mxu1 }
 0x217   :  { %v564_v7 = vadd.f32 %v595_v58, %v563_v25  ;;  %v612_v40 = vpop.f32.mrb[1].mxu1 }
 0x219   :  { %v568_v35 = vrot.slane %v564_v7, 2 }
 0x21b   :  { %v570_v37 = vadd.f32 %v568_v35, %v564_v7 }
 0x21d   :  { %v598_v1 = vmul.f32 -1.442695, %v570_v37 }
 0x21f   :  { %617 = vpow2.f32 %v598_v1 }
 0x229   :  { %v618_v43 = vpop.eup %617 }
 0x22a   :  { %v574_v36 = vadd.f32 1.0, %v618_v43 }
 0x22c   :  { %619 = vrcp.f32 %v574_v36 }
 0x236   :  { %v620_v39 = vpop.eup %619 }
 0x237   :  { %577 = vst.msk [vmem:[#allocation4] sm:$0x3] %vm25_vm0, %v620_v39 }
 0x238   :  { %632 = shalt.err (!%p629_p4)
}
 0x239   :  { %s633_s28 = scalar_lea.hbm %s1362_s5, 32 }
 0x23a   :  { %p634_p5 = scmp.ne.s32.totalorder %s1362_s5, %s633_s28  ;;  %p637_p6 = scmp.lt.u32.totalorder %s633_s28, %s1362_s5 }
 0x23c   :  { %p639_p7 = pnand %p637_p6, %p634_p5 }
 0x23e   :  { %642 = shalt.err (!%p639_p7)
}
 0x23f   :  { %587 = dma.vmem_to_hbm [thread:$0]  %s585_s3, 32, %s1362_s5, [#allocation5]  }
 0x240   :  { %643 = dma.done.wait [#allocation5], 32  }
 0x241   :  { %644 = vsyncadd [#allocation5], 4294967264 }
 0x242   :  { %591 = vsyncpa [#allocation5], 1 }

</bundles_post_ra>
